<compile_context>
chip_gen: v5e
topology: v5e:2x2
jax: 0.10.0
libtpu: 0.0.40
codegen_flags: <defaults>
</compile_context>

<pallas_src>
import functools

import jax
import jax.numpy as jnp
from jax.experimental import pallas as pl
from jax.experimental.pallas import tpu as pltpu


# ------------------------------- Pallas kernel ------------------------------ #

def _make_kernel(stride: int, has_proj: bool):
    def kernel(x_ref, w1_ref, w2_ref, w3_ref, b_ref, *rest):
        # x_ref : (stride, Lp, Cin) bf16 -- phase-split, zero-padded, channels-last
        # w1_ref: (3*Cin, P) bf16  (BN1 scale folded)
        # w2_ref, w3_ref: (3*P, P) bf16  (BN2/BN3 scale folded)
        # b_ref : (4, P) f32 -- rows: bn1 / bn2 / bn3 / shortcut biases
        # wsc_ref (optional): (Cin, P) bf16  (1x1 projection, BN_sc scale folded)
        # o_ref : (L_out, P) bf16
        if has_proj:
            wsc_ref, o_ref, halo_ref = rest
        else:
            o_ref, halo_ref = rest

        L, P = o_ref.shape
        b_all = b_ref[...]                                   # (4, P) f32
        b1, b2, b3, bsc = (b_all[i:i + 1, :] for i in range(4))

        def tap(k):
            # conv1 tap k for every output row l: xpad[l*stride + k]
            return x_ref[k % stride, pl.ds(k // stride, L), :]

        # conv1 + bn1 + relu: one K-stacked MXU matmul over the 3 strided taps.
        x1 = jnp.concatenate([tap(0), tap(1), tap(2)], axis=-1)       # (L, 3*Cin)
        h = jnp.dot(x1, w1_ref[...], preferred_element_type=jnp.float32)
        h = jnp.maximum(h + b1, 0.0)

        # Zero the halo rows once; rows [1, L] carry the current f32 intermediate.
        halo_ref[pl.ds(0, 1), :] = jnp.zeros((1, P), jnp.float32)
        halo_ref[pl.ds(L + 1, 1), :] = jnp.zeros((1, P), jnp.float32)

        def conv3_same(hf, w_ref, bias):
            # "same" k=3 conv as a single K-stacked matmul; the +-1 row shifts come
            # from the zero-haloed VMEM scratch rather than concat-built copies.
            halo_ref[pl.ds(1, L), :] = hf
            stacked = jnp.concatenate(
                [halo_ref[pl.ds(0, L), :], hf, halo_ref[pl.ds(2, L), :]], axis=-1
            ).astype(jnp.bfloat16)                                     # (L, 3*P)
            return jnp.dot(stacked, w_ref[...],
                           preferred_element_type=jnp.float32) + bias

        h2 = conv3_same(h, w2_ref, b2)                       # conv2 + bn2 (no relu)
        h3 = conv3_same(h2, w3_ref, b3)                      # conv3 + bn3

        xc = tap(1)                                          # == x[:, l*stride, :]
        if has_proj:
            sc = jnp.dot(xc, wsc_ref[...], preferred_element_type=jnp.float32) + bsc
        else:
            sc = xc.astype(jnp.float32)

        o_ref[...] = jnp.maximum(h3 + sc, 0.0).astype(o_ref.dtype)

    return kernel


# -------------------------------- JAX wrapper -------------------------------- #

def _fold_bn(gamma, beta, mean, var, eps):
    scale = (gamma / jnp.sqrt(var + eps)).astype(jnp.float32)
    bias = (beta - mean * scale).astype(jnp.float32)
    return scale, bias


def _stack_conv_w(w, scale):
    # PyTorch Conv1d weight (Cout, Cin, K) -> K-stacked (K*Cin, Cout) MXU operand,
    # with the BN scale folded along Cout in f32 *before* the bf16 cast.
    cout, cin, k = w.shape
    wt = jnp.transpose(w, (2, 1, 0)).astype(jnp.float32) * scale[None, None, :]
    return wt.reshape(k * cin, cout).astype(jnp.bfloat16)


@functools.partial(jax.jit, static_argnames=("stride", "eps"))
def resblock1_forward(x, params, *, stride=1, eps=1e-5):
    """Fused RESblock1 forward.

    x: (B, C_in, L) float32 (PyTorch NCL layout).
    Returns (B, L_out, planes) bfloat16, channels-last -- the layout/dtype the next
    block wants, so no output transpose / f32 writeback pass is emitted.
    """
    B, Cin, L = x.shape
    P = params["conv1_w"].shape[0]
    has_proj = (stride != 1) or (Cin != P)
    L_out = (L - 1) // stride + 1
    Lp = L_out + (2 // stride)                      # rows needed per stride phase

    # Single layout pass: channels-last bf16, "same" zero pad, then split the L
    # axis into `stride` phases so the kernel's tap gathers are contiguous slices.
    xt = jnp.transpose(x, (0, 2, 1)).astype(jnp.bfloat16)              # (B, L, Cin)
    total = stride * Lp
    xpad = jnp.pad(xt, ((0, 0), (1, max(0, total - 1 - L)), (0, 0)))[:, :total, :]
    x_phase = xpad.reshape(B, Lp, stride, Cin).transpose(0, 2, 1, 3)   # (B,s,Lp,Cin)

    s1, b1 = _fold_bn(*params["bn1"], eps)
    s2, b2 = _fold_bn(*params["bn2"], eps)
    s3, b3 = _fold_bn(*params["bn3"], eps)
    w1s = _stack_conv_w(params["conv1_w"], s1)                         # (3*Cin, P)
    w2s = _stack_conv_w(params["conv2_w"], s2)                         # (3*P, P)
    w3s = _stack_conv_w(params["conv3_w"], s3)                         # (3*P, P)
    if has_proj:
        ssc, bsc = _fold_bn(*params["bn_sc"], eps)
        wsc = _stack_conv_w(params["conv_sc_w"], ssc)                  # (Cin, P)
    else:
        bsc = jnp.zeros((P,), jnp.float32)
    b_all = jnp.stack([b1, b2, b3, bsc], axis=0)                       # (4, P) f32

    const = lambda shape: pl.BlockSpec(shape, lambda b: (0,) * len(shape))
    in_specs = [
        pl.BlockSpec((None, stride, Lp, Cin), lambda b: (b, 0, 0, 0)),
        const((3 * Cin, P)), const((3 * P, P)), const((3 * P, P)), const((4, P)),
    ]
    inputs = [x_phase, w1s, w2s, w3s, b_all]
    if has_proj:
        in_specs.append(const((Cin, P)))
        inputs.append(wsc)

    return pl.pallas_call(
        _make_kernel(stride, has_proj),
        grid=(B,),
        in_specs=in_specs,
        out_specs=pl.BlockSpec((None, L_out, P), lambda b: (b, 0, 0)),
        out_shape=jax.ShapeDtypeStruct((B, L_out, P), jnp.bfloat16),
        scratch_shapes=[pltpu.VMEM((L_out + 2, P), jnp.float32)],
        compiler_params=pltpu.CompilerParams(dimension_semantics=("parallel",)),
    )(*inputs)


# ----------------------------- pure-JAX reference ---------------------------- #

def _conv1d_ref(x, w, stride):
    pad = w.shape[-1] // 2
    return jax.lax.conv_general_dilated(
        x, w, window_strides=(stride,), padding=((pad, pad),),
        dimension_numbers=("NCH", "OIH", "NCH"),
        preferred_element_type=jnp.float32)


def resblock1_reference(x, params, *, stride=1, eps=1e-5):
    """Same math (folded-BN bf16 weights, bf16 activations, f32 accumulation) via
    XLA convs.  Returns (B, planes, L_out) float32 in PyTorch NCL layout."""
    Cin = x.shape[1]
    P = params["conv1_w"].shape[0]
    has_proj = (stride != 1) or (Cin != P)

    def folded_w(w, scale):
        return (w.astype(jnp.float32) * scale[:, None, None]).astype(jnp.bfloat16)

    s1, b1 = _fold_bn(*params["bn1"], eps)
    s2, b2 = _fold_bn(*params["bn2"], eps)
    s3, b3 = _fold_bn(*params["bn3"], eps)

    xb = x.astype(jnp.bfloat16)
    h = _conv1d_ref(xb, folded_w(params["conv1_w"], s1), stride) + b1[None, :, None]
    h = jax.nn.relu(h)
    h = _conv1d_ref(h.astype(jnp.bfloat16), folded_w(params["conv2_w"], s2), 1) \
        + b2[None, :, None]
    h = _conv1d_ref(h.astype(jnp.bfloat16), folded_w(params["conv3_w"], s3), 1) \
        + b3[None, :, None]

    if has_proj:
        ssc, bsc = _fold_bn(*params["bn_sc"], eps)
        sc = _conv1d_ref(xb, folded_w(params["conv_sc_w"], ssc), stride) \
             + bsc[None, :, None]
    else:
        sc = xb.astype(jnp.float32)
    return jax.nn.relu(h + sc)


# --------------------------------- init / main ------------------------------- #

def init_resblock_params(key, in_planes, planes, stride=1, dtype=jnp.float32):
    keys = iter(jax.random.split(key, 24))

    def conv_init(cout, cin, ksize):
        bound = 1.0 / (cin * ksize) ** 0.5
        return jax.random.uniform(next(keys), (cout, cin, ksize), dtype, -bound, bound)

    def bn_init(c):
        gamma = jax.random.uniform(next(keys), (c,), dtype, 0.5, 1.5)
        beta = jax.random.uniform(next(keys), (c,), dtype, -0.3, 0.3)
        mean = jax.random.uniform(next(keys), (c,), dtype, -0.2, 0.2)
        var = jax.random.uniform(next(keys), (c,), dtype, 0.5, 1.5)
        return gamma, beta, mean, var

    params = {
        "conv1_w": conv_init(planes, in_planes, 3), "bn1": bn_init(planes),
        "conv2_w": conv_init(planes, planes, 3),    "bn2": bn_init(planes),
        "conv3_w": conv_init(planes, planes, 3),    "bn3": bn_init(planes),
    }
    if stride != 1 or in_planes != planes:
        params["conv_sc_w"] = conv_init(planes, in_planes, 1)
        params["bn_sc"] = bn_init(planes)
    return params


if __name__ == "__main__":
    key = jax.random.PRNGKey(0)
    kx_a, kp_a, kx_b, kp_b = jax.random.split(key, 4)

    def check(x, params, stride):
        out = jax.block_until_ready(resblock1_forward(x, params, stride=stride))
        ref = resblock1_reference(x, params, stride=stride)
        B, Cin, L = x.shape
        P = params["conv1_w"].shape[0]
        L_out = (L - 1) // stride + 1
        assert out.shape == (B, L_out, P) and out.dtype == jnp.bfloat16
        out_ncl = jnp.transpose(out.astype(jnp.float32), (0, 2, 1))
        err = float(jnp.max(jnp.abs(out_ncl - ref)))
        assert jnp.allclose(out_ncl, ref, atol=2e-2, rtol=2e-2), f"max abs err {err}"

    # Case A: projection shortcut (stride=2, channel expansion 64 -> 128)
    x_a = jax.random.normal(kx_a, (2, 64, 128), jnp.float32)
    check(x_a, init_resblock_params(kp_a, 64, 128, 2), stride=2)

    # Case B: identity shortcut (stride=1, in_planes == planes)
    x_b = jax.random.normal(kx_b, (2, 128, 64), jnp.float32)
    check(x_b, init_resblock_params(kp_b, 128, 128, 1), stride=1)

    print("KERNEL_OK")
</pallas_src>

<mosaic_0001>
module attributes {stable_mosaic.version = 11 : i64} {
  func.func @kernel(%arg0: i32, %arg1: memref<1x2x65x64xbf16, #tpu.memory_space<vmem>>, %arg2: memref<192x128xbf16, #tpu.memory_space<vmem>>, %arg3: memref<384x128xbf16, #tpu.memory_space<vmem>>, %arg4: memref<384x128xbf16, #tpu.memory_space<vmem>>, %arg5: memref<4x128xf32, #tpu.memory_space<vmem>>, %arg6: memref<64x128xbf16, #tpu.memory_space<vmem>>, %arg7: memref<1x64x128xbf16, #tpu.memory_space<vmem>>, %arg8: memref<66x128xf32, #tpu.memory_space<vmem>>) attributes {dimension_semantics = [#tpu.dimension_semantics<parallel>], iteration_bounds = array<i64: 2>, scalar_prefetch = 0 : i64, scratch_operands = 1 : i64, tpu.core_type = #tpu.core_type<tc>, window_params = [{transform_indices = @transform_0, window_bounds = array<i64: 1, 2, 65, 64>}, {pipeline_mode = #tpu.pipeline_mode<synchronous>, transform_indices = @transform_1, window_bounds = array<i64: 192, 128>}, {pipeline_mode = #tpu.pipeline_mode<synchronous>, transform_indices = @transform_2, window_bounds = array<i64: 384, 128>}, {pipeline_mode = #tpu.pipeline_mode<synchronous>, transform_indices = @transform_3, window_bounds = array<i64: 384, 128>}, {pipeline_mode = #tpu.pipeline_mode<synchronous>, transform_indices = @transform_4, window_bounds = array<i64: 4, 128>}, {pipeline_mode = #tpu.pipeline_mode<synchronous>, transform_indices = @transform_5, window_bounds = array<i64: 64, 128>}, {transform_indices = @transform_6, window_bounds = array<i64: 1, 64, 128>}]} {
    %c0 = arith.constant 0 : index
    %c0_0 = arith.constant 0 : index
    %0 = vector.load %arg5[%c0, %c0_0] : memref<4x128xf32, #tpu.memory_space<vmem>>, vector<4x128xf32>
    %1 = vector.extract_strided_slice %0 {offsets = [0, 0], sizes = [1, 128], strides = [1, 1]} : vector<4x128xf32> to vector<1x128xf32>
    %2 = vector.extract_strided_slice %0 {offsets = [1, 0], sizes = [1, 128], strides = [1, 1]} : vector<4x128xf32> to vector<1x128xf32>
    %3 = vector.extract_strided_slice %0 {offsets = [2, 0], sizes = [1, 128], strides = [1, 1]} : vector<4x128xf32> to vector<1x128xf32>
    %4 = vector.extract_strided_slice %0 {offsets = [3, 0], sizes = [1, 128], strides = [1, 1]} : vector<4x128xf32> to vector<1x128xf32>
    %c0_1 = arith.constant 0 : index
    %c0_2 = arith.constant 0 : index
    %c0_3 = arith.constant 0 : index
    %c0_4 = arith.constant 0 : index
    %5 = vector.load %arg1[%c0_1, %c0_2, %c0_3, %c0_4] : memref<1x2x65x64xbf16, #tpu.memory_space<vmem>>, vector<1x1x64x64xbf16>
    %6 = vector.shape_cast %5 : vector<1x1x64x64xbf16> to vector<64x64xbf16>
    %c0_5 = arith.constant 0 : index
    %c1 = arith.constant 1 : index
    %c0_6 = arith.constant 0 : index
    %c0_7 = arith.constant 0 : index
    %7 = vector.load %arg1[%c0_5, %c1, %c0_6, %c0_7] : memref<1x2x65x64xbf16, #tpu.memory_space<vmem>>, vector<1x1x64x64xbf16>
    %8 = vector.shape_cast %7 : vector<1x1x64x64xbf16> to vector<64x64xbf16>
    %c0_8 = arith.constant 0 : index
    %c0_9 = arith.constant 0 : index
    %c1_10 = arith.constant 1 : index
    %c0_11 = arith.constant 0 : index
    %9 = vector.load %arg1[%c0_8, %c0_9, %c1_10, %c0_11] : memref<1x2x65x64xbf16, #tpu.memory_space<vmem>>, vector<1x1x64x64xbf16>
    %10 = vector.shape_cast %9 : vector<1x1x64x64xbf16> to vector<64x64xbf16>
    %11 = tpu.concatenate %6, %8, %10 in 1 : vector<64x64xbf16>, vector<64x64xbf16>, vector<64x64xbf16> -> vector<64x192xbf16>
    %c0_12 = arith.constant 0 : index
    %c0_13 = arith.constant 0 : index
    %12 = vector.load %arg2[%c0_12, %c0_13] : memref<192x128xbf16, #tpu.memory_space<vmem>>, vector<192x128xbf16>
    %cst = arith.constant dense<0.000000e+00> : vector<64x128xf32>
    %13 = tpu.matmul %11, %12, %cst {dimension_numbers = #tpu.dot_dimension_numbers<[1], [0], [0], [1], [0, 0, 1, 1], [], []>} : vector<64x192xbf16>, vector<192x128xbf16>, vector<64x128xf32> -> vector<64x128xf32>
    %14 = vector.broadcast %1 : vector<1x128xf32> to vector<64x128xf32>
    %15 = arith.addf %13, %14 : vector<64x128xf32>
    %cst_14 = arith.constant 0.000000e+00 : f32
    %16 = vector.broadcast %cst_14 : f32 to vector<64x128xf32>
    %17 = arith.maximumf %15, %16 : vector<64x128xf32>
    %cst_15 = arith.constant 0.000000e+00 : f32
    %18 = vector.broadcast %cst_15 : f32 to vector<1x128xf32>
    %c0_16 = arith.constant 0 : index
    %c0_17 = arith.constant 0 : index
    %19 = vector.load %arg8[%c0_16, %c0_17] : memref<66x128xf32, #tpu.memory_space<vmem>>, vector<1x128xf32>
    tpu.vector_store %arg8[%c0_16, %c0_17], %18 {strides = array<i32>} : memref<66x128xf32, #tpu.memory_space<vmem>>, vector<1x128xf32>,
    %cst_18 = arith.constant 0.000000e+00 : f32
    %20 = vector.broadcast %cst_18 : f32 to vector<1x128xf32>
    %c65 = arith.constant 65 : index
    %c0_19 = arith.constant 0 : index
    %21 = vector.load %arg8[%c65, %c0_19] : memref<66x128xf32, #tpu.memory_space<vmem>>, vector<1x128xf32>
    tpu.vector_store %arg8[%c65, %c0_19], %20 {strides = array<i32>} : memref<66x128xf32, #tpu.memory_space<vmem>>, vector<1x128xf32>,
    %c1_20 = arith.constant 1 : index
    %c0_21 = arith.constant 0 : index
    %22 = vector.load %arg8[%c1_20, %c0_21] : memref<66x128xf32, #tpu.memory_space<vmem>>, vector<64x128xf32>
    tpu.vector_store %arg8[%c1_20, %c0_21], %17 {strides = array<i32>} : memref<66x128xf32, #tpu.memory_space<vmem>>, vector<64x128xf32>,
    %c0_22 = arith.constant 0 : index
    %c0_23 = arith.constant 0 : index
    %23 = vector.load %arg8[%c0_22, %c0_23] : memref<66x128xf32, #tpu.memory_space<vmem>>, vector<64x128xf32>
    %c2 = arith.constant 2 : index
    %c0_24 = arith.constant 0 : index
    %24 = vector.load %arg8[%c2, %c0_24] : memref<66x128xf32, #tpu.memory_space<vmem>>, vector<64x128xf32>
    %25 = tpu.concatenate %23, %17, %24 in 1 : vector<64x128xf32>, vector<64x128xf32>, vector<64x128xf32> -> vector<64x384xf32>
    %26 = arith.truncf %25 : vector<64x384xf32> to vector<64x384xbf16>
    %c0_25 = arith.constant 0 : index
    %c0_26 = arith.constant 0 : index
    %27 = vector.load %arg3[%c0_25, %c0_26] : memref<384x128xbf16, #tpu.memory_space<vmem>>, vector<384x128xbf16>
    %cst_27 = arith.constant dense<0.000000e+00> : vector<64x128xf32>
    %28 = tpu.matmul %26, %27, %cst_27 {dimension_numbers = #tpu.dot_dimension_numbers<[1], [0], [0], [1], [0, 0, 1, 1], [], []>} : vector<64x384xbf16>, vector<384x128xbf16>, vector<64x128xf32> -> vector<64x128xf32>
    %29 = vector.broadcast %2 : vector<1x128xf32> to vector<64x128xf32>
    %30 = arith.addf %28, %29 : vector<64x128xf32>
    %c1_28 = arith.constant 1 : index
    %c0_29 = arith.constant 0 : index
    %31 = vector.load %arg8[%c1_28, %c0_29] : memref<66x128xf32, #tpu.memory_space<vmem>>, vector<64x128xf32>
    tpu.vector_store %arg8[%c1_28, %c0_29], %30 {strides = array<i32>} : memref<66x128xf32, #tpu.memory_space<vmem>>, vector<64x128xf32>,
    %c0_30 = arith.constant 0 : index
    %c0_31 = arith.constant 0 : index
    %32 = vector.load %arg8[%c0_30, %c0_31] : memref<66x128xf32, #tpu.memory_space<vmem>>, vector<64x128xf32>
    %c2_32 = arith.constant 2 : index
    %c0_33 = arith.constant 0 : index
    %33 = vector.load %arg8[%c2_32, %c0_33] : memref<66x128xf32, #tpu.memory_space<vmem>>, vector<64x128xf32>
    %34 = tpu.concatenate %32, %30, %33 in 1 : vector<64x128xf32>, vector<64x128xf32>, vector<64x128xf32> -> vector<64x384xf32>
    %35 = arith.truncf %34 : vector<64x384xf32> to vector<64x384xbf16>
    %c0_34 = arith.constant 0 : index
    %c0_35 = arith.constant 0 : index
    %36 = vector.load %arg4[%c0_34, %c0_35] : memref<384x128xbf16, #tpu.memory_space<vmem>>, vector<384x128xbf16>
    %cst_36 = arith.constant dense<0.000000e+00> : vector<64x128xf32>
    %37 = tpu.matmul %35, %36, %cst_36 {dimension_numbers = #tpu.dot_dimension_numbers<[1], [0], [0], [1], [0, 0, 1, 1], [], []>} : vector<64x384xbf16>, vector<384x128xbf16>, vector<64x128xf32> -> vector<64x128xf32>
    %38 = vector.broadcast %3 : vector<1x128xf32> to vector<64x128xf32>
    %39 = arith.addf %37, %38 : vector<64x128xf32>
    %c0_37 = arith.constant 0 : index
    %c1_38 = arith.constant 1 : index
    %c0_39 = arith.constant 0 : index
    %c0_40 = arith.constant 0 : index
    %40 = vector.load %arg1[%c0_37, %c1_38, %c0_39, %c0_40] : memref<1x2x65x64xbf16, #tpu.memory_space<vmem>>, vector<1x1x64x64xbf16>
    %41 = vector.shape_cast %40 : vector<1x1x64x64xbf16> to vector<64x64xbf16>
    %c0_41 = arith.constant 0 : index
    %c0_42 = arith.constant 0 : index
    %42 = vector.load %arg6[%c0_41, %c0_42] : memref<64x128xbf16, #tpu.memory_space<vmem>>, vector<64x128xbf16>
    %cst_43 = arith.constant dense<0.000000e+00> : vector<64x128xf32>
    %43 = tpu.matmul %41, %42, %cst_43 {dimension_numbers = #tpu.dot_dimension_numbers<[1], [0], [0], [1], [0, 0, 1, 1], [], []>} : vector<64x64xbf16>, vector<64x128xbf16>, vector<64x128xf32> -> vector<64x128xf32>
    %44 = vector.broadcast %4 : vector<1x128xf32> to vector<64x128xf32>
    %45 = arith.addf %43, %44 : vector<64x128xf32>
    %46 = arith.addf %39, %45 : vector<64x128xf32>
    %cst_44 = arith.constant 0.000000e+00 : f32
    %47 = vector.broadcast %cst_44 : f32 to vector<64x128xf32>
    %48 = arith.maximumf %46, %47 : vector<64x128xf32>
    %49 = arith.truncf %48 : vector<64x128xf32> to vector<64x128xbf16>
    %c0_45 = arith.constant 0 : index
    %c0_46 = arith.constant 0 : index
    %c0_47 = arith.constant 0 : index
    %50 = vector.load %arg7[%c0_45, %c0_46, %c0_47] : memref<1x64x128xbf16, #tpu.memory_space<vmem>>, vector<1x64x128xbf16>
    %51 = vector.shape_cast %50 : vector<1x64x128xbf16> to vector<64x128xbf16>
    %52 = vector.shape_cast %49 : vector<64x128xbf16> to vector<1x64x128xbf16>
    tpu.vector_store %arg7[%c0_45, %c0_46, %c0_47], %52 {strides = array<i32>} : memref<1x64x128xbf16, #tpu.memory_space<vmem>>, vector<1x64x128xbf16>,
    return
  }
  func.func @transform_0(%arg0: i32) -> (i32, i32, i32, i32) {
    %c0_i32 = arith.constant 0 : i32
    %c0_i32_0 = arith.constant 0 : i32
    %c0_i32_1 = arith.constant 0 : i32
    %c0_i32_2 = arith.constant 0 : i32
    return %arg0, %c0_i32, %c0_i32_0, %c0_i32_1 : i32, i32, i32, i32
  }
  func.func @transform_1(%arg0: i32) -> (i32, i32) {
    %c0_i32 = arith.constant 0 : i32
    %c0_i32_0 = arith.constant 0 : i32
    %c0_i32_1 = arith.constant 0 : i32
    return %c0_i32, %c0_i32_0 : i32, i32
  }
  func.func @transform_2(%arg0: i32) -> (i32, i32) {
    %c0_i32 = arith.constant 0 : i32
    %c0_i32_0 = arith.constant 0 : i32
    %c0_i32_1 = arith.constant 0 : i32
    return %c0_i32, %c0_i32_0 : i32, i32
  }
  func.func @transform_3(%arg0: i32) -> (i32, i32) {
    %c0_i32 = arith.constant 0 : i32
    %c0_i32_0 = arith.constant 0 : i32
    %c0_i32_1 = arith.constant 0 : i32
    return %c0_i32, %c0_i32_0 : i32, i32
  }
  func.func @transform_4(%arg0: i32) -> (i32, i32) {
    %c0_i32 = arith.constant 0 : i32
    %c0_i32_0 = arith.constant 0 : i32
    %c0_i32_1 = arith.constant 0 : i32
    return %c0_i32, %c0_i32_0 : i32, i32
  }
  func.func @transform_5(%arg0: i32) -> (i32, i32) {
    %c0_i32 = arith.constant 0 : i32
    %c0_i32_0 = arith.constant 0 : i32
    %c0_i32_1 = arith.constant 0 : i32
    return %c0_i32, %c0_i32_0 : i32, i32
  }
  func.func @transform_6(%arg0: i32) -> (i32, i32, i32) {
    %c0_i32 = arith.constant 0 : i32
    %c0_i32_0 = arith.constant 0 : i32
    %c0_i32_1 = arith.constant 0 : i32
    return %arg0, %c0_i32, %c0_i32_0 : i32, i32, i32
  }
}

</mosaic_0001>

<bundles_post_ra>
// kernel: resblock1_forward.1
= control target key start
LH: loop header
LB: loop body
LE: loop exit
PB: predicated region body
PF: predicated region fallthrough
CT: control target
= control target key end

     0   :  { %11 = vsyncpa [#allocation4], 0  ;;  %s2354_s0 = inlined_call_operand.vmem [shape: bf16[2,2,65,64], index: 0, kind: input, shape index: {}]   ;;  %s2355_s1 = inlined_call_operand.vmem [shape: bf16[192,128], index: 1, kind: input, shape index: {}]   ;;  %s2356_s2 = inlined_call_operand.vmem [shape: bf16[384,128], index: 2, kind: input, shape index: {}]   ;;  %s2357_s3 = inlined_call_operand.vmem [shape: bf16[384,128], index: 3, kind: input, shape index: {}]   ;;  %s2358_s4 = inlined_call_operand.vmem [shape: f32[4,128], index: 4, kind: input, shape index: {}]   ;;  %s2359_s5 = inlined_call_operand.vmem [shape: bf16[64,128], index: 5, kind: input, shape index: {}]   ;;  %s2360_s6 = inlined_call_operand.hbm [shape: bf16[2,64,128], index: 6, kind: output, shape index: {}]  }
   0x1   :  { %13 = vsyncpa [#allocation4 + $0x1], 0  ;;  %s1980_s21 = smov 0   ;;  %s1982_s22 = smov 0  }
   0x2   :  { %s1984_s23 = smov 0   ;;  %s1986_s24 = smov 0  }
   0x3 LB: > { %s2001_s25 = sadd.s32 4294967295, %s1940_s24   ;;  %s1392_s26 = sadd.s32 4294967294, %s1940_s24   ;;  %s1940_s24 = sphi %s1986_s24, %s2366_s24   ;;  %s1936_s23 = sphi %s1984_s23, %s2365_s23   ;;  %s1932_s22 = sphi %s1982_s22, %s2364_s22   ;;  %s1928_s21 = sphi %s1980_s21, %s2363_s21  }
   0x4   : > { %s2005_s27 = sadd.s32 1, %s1940_s24   ;;  %s157_s28 = sadd.s32 1, %s1936_s23 }
   0x5   : > { %s154_s29 = ssub.s32 %s1940_s24, %s2005_s27  ;;  %p167_p0 = scmp.ne.s32.totalorder %s1936_s23, %s1932_s22 }
   0x6   : > { %p155_p1 = scmp.eq.s32.totalorder %s154_s29, 0  ;;  %p168_p2 = scmp.eq.s32.totalorder %s2001_s25, 1 }
   0x7   : > { %p173_p3 = scmp.ne.s32.totalorder %s1932_s22, %s1928_s21  ;;  %p174_p4 = scmp.eq.s32.totalorder %s1392_s26, 1 }
   0x8   : > { %s2016_s30 = scalar_select %p155_p1, %s1936_s23, %s157_s28  }
   0x9   : > { %p2018_p5 = por %p168_p2, %p167_p0  ;;  %p2022_p6 = por %p174_p4, %p173_p3 }
   0xa   : > { %p1395_p7 = scmp.ge.s32.totalorder %s1940_s24, 1  ;;  %p215_p8 = scmp.lt.s32.totalorder %s1940_s24, 3 }
   0xc   : > { %p216_p9 = pnand %p1395_p7, %p215_p8 }
   0xd   : > { %p245_p10 = scmp.lt.s32.totalorder (!%p216_p9), %s2001_s25, 1  ;;  %s1942_s11 = smov (!%p216_p9), 64  }
   0xe   : > { %219 = sbr.rel (%p216_p9) target bundleno = 656 (0x290), region = 44  ;;  %s1807_s15 = sshll.u32 (!%p216_p9), %s2001_s25, 5 }
   0xf   : > { %s1898_s12 = scalar_lea.hbm (!%p216_p9), %s2360_s6, 64 }
  0x13   : > { %v1746_v0 = vld [vmem:[%s2355_s1 + $0x38] sm:$0xff]  ;;  %s246_s13 = scalar_select %p245_p10, %s2001_s25, 1  ;;  %v1745_v2 = vld [vmem:[%s2355_s1 + $0x30] sm:$0xff]  ;;  %v1744_v4 = vld [vmem:[%s2355_s1 + $0x28] sm:$0xff]  ;;  %vm321_vm0 = vsmask.f32 7424 }
  0x14   : > { %v1750_v1 = vld [vmem:[%s2355_s1 + $0x58] sm:$0xff]  ;;  %480 = vmatpush.bf16.msra.mxu0 %v1746_v0  ;;  %v1749_v3 = vld [vmem:[%s2355_s1 + $0x50] sm:$0xff]  ;;  %v1748_v7 = vld [vmem:[%s2355_s1 + $0x48] sm:$0xff]  ;;  %vm358_vm1 = vcmask 523264  }
  0x15   : > { %513 = vmatpush.bf16.msra.mxu1 %v1750_v1  ;;  %1831 = vmatpush.bf16.msra.mxu2 %v1750_v1  ;;  %s1835_s18 = smul.u32 72, %s246_s13  ;;  %v1743_v10 = vld [vmem:[%s2355_s1 + $0x20] sm:$0xff]  ;;  %v1742_v19 = vld [vmem:[%s2355_s1 + $0x18] sm:$0xff]  ;;  %v1741_v22 = vld [vmem:[%s2355_s1 + $0x10] sm:$0xff]  ;;  %v1943_v1 = vmov 0.0  }
  0x16   : > { %v1747_v14 = vld [vmem:[%s2355_s1 + $0x40] sm:$0xff]  ;;  %v1740_v23 = vld [vmem:[%s2355_s1 + $0x8] sm:$0xff]  ;;  %v1766_v49 = vld [vmem:[%s2356_s2 + $0x78] sm:$0xff]  ;;  %546 = vst [vmem:[#allocation2] sm:$0x1] %v1943_v1 }
  0x17   : > { %s2045_s26 = scalar_lea.vmem %s2354_s0, %s1835_s18  ;;  %v1739_v24 = vld [vmem:[%s2355_s1] sm:$0xff]  ;;  %v1758_v50 = vld [vmem:[%s2356_s2 + $0x38] sm:$0xff]  ;;  %806 = vmatpush.bf16.msra.mxu3 %v1766_v49  ;;  %v1765_v51 = vld [vmem:[%s2356_s2 + $0x70] sm:$0xff]  ;;  %547 = vst [vmem:[#allocation2 + $0x41] sm:$0x1] %v1943_v1  ;;  %s1326_s18 = scalar_lea.hbm %s2360_s6, %s1807_s15 }
  0x18   : > { %481 = vmatpush.bf16.msra.mxu0 %v1745_v2  ;;  %v1735_v5 = vld [vmem:[%s2045_s26 + $0x24] sm:$0xff]  ;;  %v1737_v6 = vld [vmem:[%s2045_s26 + $0x34] sm:$0xff]  ;;  %v1736_v17 = vld [vmem:[%s2045_s26 + $0x2c] sm:$0xff]  ;;  %s1329_s20 = sshll.u32 %s1326_s18, 4  ;;  %s1330_s20 = int_to_ptr.hbm [resolvable:$true] %s1329_s20 }
  0x19   : > { %514 = vmatpush.bf16.msra.mxu1 %v1749_v3  ;;  %1832 = vmatpush.bf16.msra.mxu2 %v1749_v3  ;;  %v1731_v8 = vld [vmem:[%s2045_s26] sm:$0xff]  ;;  %v1732_v9 = vld [vmem:[%s2045_s26 + $0x8] sm:$0xff]  ;;  %v1733_v25 = vld [vmem:[%s2045_s26 + $0x10] sm:$0xff]  ;;  %s1892_s28 = sshra.s32 %s1330_s20, 4  ;;  %s1893_s28 = int_to_ptr.hbm [resolvable:$true] %s1892_s28 }
  0x1a   : > { %310 = vrot.lane.b32.xlu0 %v1735_v5, %s1942_s11  ;;  %314 = vrot.lane.b32.xlu1 %v1737_v6, %s1942_s11  ;;  %v323_v11 = vshrl.u32 %v1731_v8, 16  ;;  %v325_v12 = vshll.u32 %v1731_v8, 16  ;;  %v330_v13 = vshll.u32 %v1732_v9, 16  ;;  %v1738_v18 = vld [vmem:[%s2045_s26 + $0x3c] sm:$0xff]  ;;  %v334_v26 = vshrl.u32 %v1732_v9, 16  ;;  %v1757_v52 = vld [vmem:[%s2356_s2 + $0x30] sm:$0xff]  ;;  %p1899_p0 = scmp.lt.s32.totalorder %s1893_s28, %s2360_s6 }
  0x1b   : > { %v338_v28 = vshll.u32 %v1733_v25, 16  ;;  %v1734_v31 = vld [vmem:[%s2045_s26 + $0x18] sm:$0xff]  ;;  %v342_v32 = vshrl.u32 %v1733_v25, 16  ;;  %v269_v37 = vld [vmem:[%s2045_s26 + $0x20] sm:$0x1]  ;;  %807 = vmatpush.bf16.msra.mxu3 %v1765_v51  ;;  %v1764_v53 = vld [vmem:[%s2356_s2 + $0x68] sm:$0xff] }
  0x1c   : > { %482 = vmatpush.bf16.msra.mxu0 %v1744_v4  ;;  %v327_v15 = vrot.slane %v325_v12, 1  ;;  %v332_v16 = vrot.slane %v330_v13, 1  ;;  %v346_v33 = vshll.u32 %v1734_v31, 16  ;;  %v319_v38 = vunpack.c.l.b16 %v269_v37  ;;  %v1763_v55 = vld [vmem:[%s2356_s2 + $0x60] sm:$0xff]  ;;  %v1756_v59 = vld [vmem:[%s2356_s2 + $0x28] sm:$0xff]  ;;  %v1762_v60 = vld [vmem:[%s2356_s2 + $0x58] sm:$0xff] }
  0x1d   : > { %515 = vmatpush.bf16.msra.mxu1 %v1748_v7  ;;  %1833 = vmatpush.bf16.msra.mxu2 %v1748_v7  ;;  %v340_v29 = vrot.slane %v338_v28, 1  ;;  %v350_v42 = vshrl.u32 %v1734_v31, 16  ;;  %v1774_v61 = vld [vmem:[%s2356_s2 + $0xb8] sm:$0xff]  ;;  %v1755_v62 = vld [vmem:[%s2356_s2 + $0x20] sm:$0xff]  ;;  %v1761_v63 = vld [vmem:[%s2356_s2 + $0x50] sm:$0xff]  ;;  %s1894_s29 = scalar_lea.hbm %s1893_s28, 32 }
  0x1e   : > { %v328_v20 = vor.u32 %v327_v15, %v323_v11  ;;  %v336_v27 = vor.u32 %v334_v26, %v332_v16  ;;  %v348_v35 = vrot.slane %v346_v33, 1  ;;  %v320_v39 = vpack.c.b16 %v319_v38, %v319_v38  ;;  %v1773_v0 = vld [vmem:[%s2356_s2 + $0xb0] sm:$0xff]  ;;  %v1754_v2 = vld [vmem:[%s2356_s2 + $0x18] sm:$0xff]  ;;  %v1760_v3 = vld [vmem:[%s2356_s2 + $0x48] sm:$0xff]  ;;  %p1895_p11 = scmp.ne.s32.totalorder %s1893_s28, %s1894_s29  ;;  %p1900_p1 = scmp.lt.s32.totalorder %s1898_s12, %s1894_s29 }
  0x1f   : > { %v344_v34 = vor.u32 %v342_v32, %v340_v29  ;;  %808 = vmatpush.bf16.msra.mxu3 %v1764_v53  ;;  %v1772_v4 = vld [vmem:[%s2356_s2 + $0xa8] sm:$0xff]  ;;  %v1753_v5 = vld [vmem:[%s2356_s2 + $0x10] sm:$0xff]  ;;  %v1759_v6 = vld [vmem:[%s2356_s2 + $0x40] sm:$0xff] }
  0x20   : > { %483 = vmatpush.bf16.msra.mxu0 %v1743_v10  ;;  %v333_v21 = vsel %vm321_vm0, %v328_v20, %v332_v16  ;;  %v341_v30 = vsel %vm321_vm0, %v336_v27, %v340_v29  ;;  %v354_v43 = vshll.u32 %v320_v39, 16  ;;  %v352_v44 = vor.u32 %v350_v42, %v348_v35  ;;  %v1771_v7 = vld [vmem:[%s2356_s2 + $0xa0] sm:$0xff]  ;;  %v1769_v11 = vld [vmem:[%s2356_s2 + $0x90] sm:$0xff]  ;;  %v1768_v12 = vld [vmem:[%s2356_s2 + $0x88] sm:$0xff]  ;;  %p1896_p12 = pnand %p1895_p11, %p2018_p5  ;;  %p1901_p2 = por %p1900_p1, %p1899_p0 }
  0x21   : > { %516 = vmatpush.bf16.msra.mxu1 %v1747_v14  ;;  %1834 = vmatpush.bf16.msra.mxu2 %v1747_v14  ;;  %v349_v36 = vsel %vm321_vm0, %v344_v34, %v348_v35  ;;  %v1751_v10 = vld [vmem:[%s2356_s2] sm:$0xff]  ;;  %v1798_v1 = vld [vmem:[%s2357_s3 + $0xb8] sm:$0xff] }
  0x22   : > { %312 = vrot.lane.b32.xlu0 %v1736_v17, %s1942_s11  ;;  %316 = vrot.lane.b32.xlu1 %v1738_v18, %s1942_s11  ;;  %v356_v45 = vrot.slane %v354_v43, 1  ;;  %v2168_v13 = vld [vmem:[%s2358_s4] sm:$0xf]  ;;  %p1897_p13 = pneg %p1896_p12 }
  0x23   : > { %809 = vmatpush.bf16.msra.mxu3 %v1763_v55  ;;  %v1767_v15 = vld [vmem:[%s2356_s2 + $0x80] sm:$0xff]  ;;  %v2174_v16 = vperm.slane %v2168_v13, 0 }
  0x24   : > { %484 = vmatpush.bf16.msra.mxu0 %v1742_v19  ;;  %1486 = vmatmul.msk.bf16.vlgmr.msra.gmra.mxu1 %vm358_vm1, %v333_v21  ;;  %v357_v46 = vsel %vm321_vm0, %v352_v44, %v356_v45  ;;  %p1902_p3 = pnand %p1901_p2, %p1897_p13 }
  0x25   : > { %1488 = vmatmul.msk.bf16.vlgmr.msra.gmra.mxu2 %vm358_vm1, %v349_v36  ;;  %835 = vmatpush.bf16.msrb.mxu1 %v1774_v61 }
  0x26   : > { %777 = vmatpush.bf16.msrb.mxu2 %v1758_v50 }
  0x27   : > { %810 = vmatpush.bf16.msra.mxu3 %v1762_v60 }
  0x28   : > { %485 = vmatpush.bf16.msra.mxu0 %v1741_v22 }
  0x29   : > { %836 = vmatpush.bf16.msrb.mxu1 %v1773_v0  ;;  %v1790_v0 = vld [vmem:[%s2357_s3 + $0x78] sm:$0xff] }
  0x2a   : > { %778 = vmatpush.bf16.msrb.mxu2 %v1757_v52 }
  0x2b   : > { %811 = vmatpush.bf16.msra.mxu3 %v1761_v63 }
  0x2c   : > { %486 = vmatpush.bf16.msra.mxu0 %v1740_v23 }
  0x2d   : > { %837 = vmatpush.bf16.msrb.mxu1 %v1772_v4 }
  0x2e   : > { %779 = vmatpush.bf16.msrb.mxu2 %v1756_v59 }
  0x2f   : > { %812 = vmatpush.bf16.msra.mxu3 %v1760_v3  ;;  %v1806_v3 = vld [vmem:[%s2359_s5 + $0x18] sm:$0xff] }
  0x30   : > { %487 = vmatpush.bf16.msra.mxu0 %v1739_v24 }
  0x31   : > { %838 = vmatpush.bf16.msrb.mxu1 %v1771_v7  ;;  %v1781_v7 = vld [vmem:[%s2357_s3 + $0x30] sm:$0xff] }
  0x32   : > { %780 = vmatpush.bf16.msrb.mxu2 %v1755_v62 }
  0x33   : > { %813 = vmatpush.bf16.msra.mxu3 %v1759_v6  ;;  %v1797_v6 = vld [vmem:[%s2357_s3 + $0xb0] sm:$0xff] }
  0x34   : > { %1487 = vmatmul.msk.bf16.gmra.mxu1 %vm358_vm1, %v341_v30 }
  0x35   : > { %1489 = vmatmul.msk.bf16.gmra.mxu2 %vm358_vm1, %v357_v46 }
  0x36   : > { %781 = vmatpush.bf16.msrb.mxu2 %v1754_v2  ;;  %v1782_v2 = vld [vmem:[%s2357_s3 + $0x38] sm:$0xff] }
  0x37   : > { %1151 = vmatpush.bf16.msrb.mxu3 %v1798_v1  ;;  %1093 = vmatpush.bf16.msrb.mxu0 %v1782_v2 }
  0x3a   : > { %782 = vmatpush.bf16.msrb.mxu2 %v1753_v5  ;;  %v1789_v5 = vld [vmem:[%s2357_s3 + $0x70] sm:$0xff] }
  0x3b   : > { %1152 = vmatpush.bf16.msrb.mxu3 %v1797_v6  ;;  %1094 = vmatpush.bf16.msrb.mxu0 %v1781_v7 }
  0x8c   : > { %v311_v40 = vpop.permute.xlu0 %310  ;;  %v315_v54 = vpop.permute.xlu1 %314 }
  0x8d   : > { %v360_v41 = vsel %vm358_vm1, %v1731_v8, %v311_v40  ;;  %v366_v56 = vsel %vm358_vm1, %v1733_v25, %v315_v54  ;;  %v1752_v8 = vld [vmem:[%s2356_s2 + $0x8] sm:$0xff] }
  0x8e   : > { %488 = vmatmul.bf16.vlgmr.msra.gmra.mxu0 %v360_v41  ;;  %783 = vmatpush.bf16.msrb.mxu2 %v1752_v8  ;;  %v1805_v8 = vld [vmem:[%s2359_s5 + $0x10] sm:$0xff] }
  0x92   : > { %784 = vmatpush.bf16.msrb.mxu2 %v1751_v10 }
  0x94   : > { %v313_v47 = vpop.permute.xlu0 %312  ;;  %v317_v57 = vpop.permute.xlu1 %316 }
  0x95   : > { %v363_v48 = vsel %vm358_vm1, %v1732_v9, %v313_v47  ;;  %v369_v58 = vsel %vm358_vm1, %v1734_v31, %v317_v57  ;;  %v1770_v9 = vld [vmem:[%s2356_s2 + $0x98] sm:$0xff] }
  0x96   : > { %839 = vmatpush.bf16.msrb.mxu1 %v1770_v9  ;;  %1122 = vmatpush.bf16.msra.mxu2 %v1790_v0  ;;  %v1800_v0 = vld [vmem:[%s2045_s26 + $0x2c] sm:$0xff] }
  0x9a   : > { %840 = vmatpush.bf16.msrb.mxu1 %v1769_v11  ;;  %1123 = vmatpush.bf16.msra.mxu2 %v1789_v5 }
  0x9e   : > { %493 = vmatmul.bf16.gmra.mxu0 %v363_v48  ;;  %841 = vmatpush.bf16.msrb.mxu1 %v1768_v12 }
  0xa1   : > { %v518_v14 = vpop.f32.mrf.mxu1 }
  0xa2   : > { %842 = vmatpush.bf16.msrb.mxu1 %v1767_v15  ;;  %v1796_v15 = vld [vmem:[%s2357_s3 + $0xa8] sm:$0xff] }
  0xa3   : > { %1153 = vmatpush.bf16.msrb.mxu3 %v1796_v15 }
  0xa6   : > { %1257 = vmatpush.bf16.msra.mxu1 %v1806_v3 }
  0xa8   : > { %v528_v39 = vpop.f32.mrf.mxu2 }
  0xa9   : > { %v520_v21 = vpop.f32.mrf.mxu1 }
  0xaa   : > { %1258 = vmatpush.bf16.msra.mxu1 %v1805_v8 }
  0xae   : > { %498 = vmatmul.bf16.gmra.mxu0 %v366_v56 }
  0xb0   : > { %v530_v49 = vpop.f32.mrf.mxu2 }
  0xb1   : > { %v523_v27 = vpop.f32.mrf.mxu1 }
  0xb8   : > { %v533_v61 = vpop.f32.mrf.mxu2 }
  0xb9   : > { %v525_v37 = vpop.f32.mrf.mxu1 }
  0xbe   : > { %503 = vmatmul.bf16.gmra.mxu0 %v369_v58 }
 0x10b   : > { %v489_v17 = vpop.f32.mrf.mxu0 }
 0x10c   : > { %v490_v18 = vadd.f32 %v489_v17, %v2174_v16 }
 0x10e   : > { %v519_v19 = vadd.f32 %v518_v14, %v490_v18  ;;  %v1788_v14 = vld [vmem:[%s2357_s3 + $0x68] sm:$0xff] }
 0x10f   : > { %v1780_v18 = vld [vmem:[%s2357_s3 + $0x28] sm:$0xff]  ;;  %1124 = vmatpush.bf16.msra.mxu2 %v1788_v14 }
 0x110   : > { %v538_v20 = vmax.f32 %v519_v19, 0.0  ;;  %1095 = vmatpush.bf16.msrb.mxu0 %v1780_v18 }
 0x112   : > { %548 = vst [vmem:[#allocation2 + $0x1] sm:$0xff] %v538_v20 }
 0x113   : > { %v491_v22 = vpop.f32.mrf.mxu0 }
 0x114   : > { %v492_v23 = vadd.f32 %v491_v22, %v2174_v16  ;;  %v1787_v22 = vld [vmem:[%s2357_s3 + $0x60] sm:$0xff] }
 0x115   : > { %1125 = vmatpush.bf16.msra.mxu2 %v1787_v22 }
 0x116   : > { %v521_v24 = vadd.f32 %v520_v21, %v492_v23 }
 0x118   : > { %v539_v25 = vmax.f32 %v521_v24, 0.0 }
 0x119   : > { %v556_v32 = vld [vmem:[#allocation2] sm:$0xff] }
 0x11a   : > { %549 = vst [vmem:[#allocation2 + $0x9] sm:$0xff] %v539_v25  ;;  %v573_v26 = vpack.c.bf16 %v539_v25, %v538_v20  ;;  %v535_v20 = vpop.f32.mrf.mxu2 }
 0x11b   : > { %v494_v28 = vpop.f32.mrf.mxu0 }
 0x11c   : > { %v495_v29 = vadd.f32 %v494_v28, %v2174_v16  ;;  %814 = vmatmul.bf16.vlgmr.msra.gmra.mxu3 %v573_v26 }
 0x11e   : > { %v524_v30 = vadd.f32 %v523_v27, %v495_v29 }
 0x120   : > { %v540_v31 = vmax.f32 %v524_v30, 0.0 }
 0x121   : > { %v557_v33 = vld [vmem:[#allocation2 + $0x8] sm:$0xff] }
 0x122   : > { %550 = vst [vmem:[#allocation2 + $0x11] sm:$0xff] %v540_v31  ;;  %v572_v34 = vpack.c.bf16 %v557_v33, %v556_v32  ;;  %v564_v41 = vld [vmem:[#allocation2 + $0x2] sm:$0xff] }
 0x123   : > { %v496_v35 = vpop.f32.mrf.mxu0  ;;  %v1795_v33 = vld [vmem:[%s2357_s3 + $0xa0] sm:$0xff] }
 0x124   : > { %v497_v36 = vadd.f32 %v496_v35, %v2174_v16  ;;  %785 = vmatmul.bf16.vlgmr.msrb.gmra.mxu2 %v572_v34  ;;  %v1779_v34 = vld [vmem:[%s2357_s3 + $0x20] sm:$0xff]  ;;  %v1786_v35 = vld [vmem:[%s2357_s3 + $0x58] sm:$0xff]  ;;  %1154 = vmatpush.bf16.msrb.mxu3 %v1795_v33 }
 0x125   : > { %1096 = vmatpush.bf16.msrb.mxu0 %v1779_v34  ;;  %1126 = vmatpush.bf16.msra.mxu2 %v1786_v35 }
 0x126   : > { %v526_v38 = vadd.f32 %v525_v37, %v497_v36  ;;  %v1794_v36 = vld [vmem:[%s2357_s3 + $0x98] sm:$0xff]  ;;  %v1785_v37 = vld [vmem:[%s2357_s3 + $0x50] sm:$0xff] }
 0x128   : > { %v541_v40 = vmax.f32 %v526_v38, 0.0  ;;  %1155 = vmatpush.bf16.msrb.mxu3 %v1794_v36  ;;  %v1778_v38 = vld [vmem:[%s2357_s3 + $0x18] sm:$0xff] }
 0x129   : > { %v565_v42 = vld [vmem:[#allocation2 + $0xa] sm:$0xff]  ;;  %1127 = vmatpush.bf16.msra.mxu2 %v1785_v37  ;;  %1097 = vmatpush.bf16.msrb.mxu0 %v1778_v38  ;;  %v1802_v36 = vld [vmem:[%s2045_s26 + $0x3c] sm:$0xff] }
 0x12a   : > { %551 = vst [vmem:[#allocation2 + $0x19] sm:$0xff] %v541_v40  ;;  %v576_v43 = vpack.c.bf16 %v541_v40, %v540_v31  ;;  %v574_v44 = vpack.c.bf16 %v565_v42, %v564_v41  ;;  %v558_v50 = vld [vmem:[#allocation2 + $0x10] sm:$0xff]  ;;  %v1784_v40 = vld [vmem:[%s2357_s3 + $0x48] sm:$0xff] }
 0x12b   : > { %v499_v45 = vpop.f32.mrf.mxu0  ;;  %v1793_v41 = vld [vmem:[%s2357_s3 + $0x90] sm:$0xff] }
 0x12c   : > { %v500_v46 = vadd.f32 %v499_v45, %v2174_v16  ;;  %819 = vmatmul.bf16.gmra.mxu3 %v576_v43  ;;  %843 = vmatmul.bf16.vlgmr.msrb.gmra.mxu1 %v574_v44  ;;  %v1777_v42 = vld [vmem:[%s2357_s3 + $0x10] sm:$0xff]  ;;  %v1783_v43 = vld [vmem:[%s2357_s3 + $0x40] sm:$0xff]  ;;  %v1776_v44 = vld [vmem:[%s2357_s3 + $0x8] sm:$0xff] }
 0x12d   : > { %1128 = vmatpush.bf16.msra.mxu2 %v1784_v40  ;;  %1156 = vmatpush.bf16.msrb.mxu3 %v1793_v41  ;;  %v1792_v45 = vld [vmem:[%s2357_s3 + $0x88] sm:$0xff] }
 0x12e   : > { %v529_v47 = vadd.f32 %v528_v39, %v500_v46  ;;  %v1804_v39 = vld [vmem:[%s2359_s5 + $0x8] sm:$0xff]  ;;  %1098 = vmatpush.bf16.msrb.mxu0 %v1777_v42  ;;  %v1775_v46 = vld [vmem:[%s2357_s3] sm:$0xff] }
 0x12f   : > { %1259 = vmatpush.bf16.msra.mxu1 %v1804_v39 }
 0x130   : > { %v542_v48 = vmax.f32 %v529_v47, 0.0  ;;  %v1803_v47 = vld [vmem:[%s2359_s5] sm:$0xff] }
 0x131   : > { %v559_v51 = vld [vmem:[#allocation2 + $0x18] sm:$0xff]  ;;  %1129 = vmatpush.bf16.msra.mxu2 %v1783_v43  ;;  %1157 = vmatpush.bf16.msrb.mxu3 %v1792_v45 }
 0x132   : > { %552 = vst [vmem:[#allocation2 + $0x21] sm:$0xff] %v542_v48  ;;  %v575_v52 = vpack.c.bf16 %v559_v51, %v558_v50  ;;  %v566_v57 = vld [vmem:[#allocation2 + $0x12] sm:$0xff]  ;;  %1099 = vmatpush.bf16.msrb.mxu0 %v1776_v44  ;;  %v2269_v50 = vperm.slane %v2168_v13, 1  ;;  %v1799_v51 = vld [vmem:[%s2045_s26 + $0x24] sm:$0xff] }
 0x133   : > { %v501_v53 = vpop.f32.mrf.mxu0  ;;  %1260 = vmatpush.bf16.msra.mxu1 %v1803_v47 }
 0x134   : > { %v502_v54 = vadd.f32 %v501_v53, %v2174_v16  ;;  %790 = vmatmul.bf16.gmra.mxu2 %v575_v52 }
 0x136   : > { %v531_v55 = vadd.f32 %v530_v49, %v502_v54  ;;  %1100 = vmatpush.bf16.msrb.mxu0 %v1775_v46  ;;  %v1791_v49 = vld [vmem:[%s2357_s3 + $0x80] sm:$0xff] }
 0x137   : > { %1158 = vmatpush.bf16.msrb.mxu3 %v1791_v49 }
 0x138   : > { %v543_v56 = vmax.f32 %v531_v55, 0.0 }
 0x139   : > { %v567_v58 = vld [vmem:[#allocation2 + $0x1a] sm:$0xff] }
 0x13a   : > { %553 = vst [vmem:[#allocation2 + $0x29] sm:$0xff] %v543_v56  ;;  %v579_v59 = vpack.c.bf16 %v543_v56, %v542_v48  ;;  %v577_v60 = vpack.c.bf16 %v567_v58, %v566_v57  ;;  %v560_v10 = vld [vmem:[#allocation2 + $0x20] sm:$0xff] }
 0x13b   : > { %v504_v62 = vpop.f32.mrf.mxu0 }
 0x13c   : > { %v505_v63 = vadd.f32 %v504_v62, %v2174_v16  ;;  %824 = vmatmul.bf16.gmra.mxu3 %v579_v59  ;;  %848 = vmatmul.bf16.gmra.mxu1 %v577_v60 }
 0x13e   : > { %v534_v4 = vadd.f32 %v533_v61, %v505_v63 }
 0x140   : > { %v544_v9 = vmax.f32 %v534_v4, 0.0 }
 0x141   : > { %v561_v11 = vld [vmem:[#allocation2 + $0x28] sm:$0xff] }
 0x142   : > { %554 = vst [vmem:[#allocation2 + $0x31] sm:$0xff] %v544_v9  ;;  %v578_v12 = vpack.c.bf16 %v561_v11, %v560_v10  ;;  %v568_v24 = vld [vmem:[#allocation2 + $0x22] sm:$0xff] }
 0x143   : > { %v506_v17 = vpop.f32.mrf.mxu0 }
 0x144   : > { %v507_v19 = vadd.f32 %v506_v17, %v2174_v16  ;;  %795 = vmatmul.bf16.gmra.mxu2 %v578_v12 }
 0x146   : > { %v536_v21 = vadd.f32 %v535_v20, %v507_v19  ;;  %v1801_v19 = vld [vmem:[%s2045_s26 + $0x34] sm:$0xff]  ;;  %s242_s26 = sand.u32 1, %s1932_s22  }
 0x147   : > { %s1396_s13 = sshll.u32 %s242_s26, 5  ;;  %s1315_s25 = scalar_lea.sflag [#allocation4], %s242_s26 }
 0x148   : > { %v545_v23 = vmax.f32 %v536_v21, 0.0  ;;  %s2301_s14 = scalar_lea.vmem [#allocation3], %s1396_s13 }
 0x149   : > { %v569_v25 = vld [vmem:[#allocation2 + $0x2a] sm:$0xff]  ;;  %s1327_s19 = sshll.u32 %s2301_s14, 4  ;;  %s1328_s19 = int_to_ptr.vmem [resolvable:$true] %s1327_s19 }
 0x14a   : > { %555 = vst [vmem:[#allocation2 + $0x39] sm:$0xff] %v545_v23  ;;  %v582_v26 = vpack.c.bf16 %v545_v23, %v544_v9  ;;  %v580_v27 = vpack.c.bf16 %v569_v25, %v568_v24  ;;  %v562_v16 = vld [vmem:[#allocation2 + $0x30] sm:$0xff] }
 0x14c   : > { %829 = vmatmul.bf16.gmra.mxu3 %v582_v26  ;;  %853 = vmatmul.bf16.gmra.mxu1 %v580_v27 }
 0x151   : > { %v563_v28 = vld [vmem:[#allocation2 + $0x38] sm:$0xff] }
 0x152   : > { %v581_v29 = vpack.c.bf16 %v563_v28, %v562_v16  ;;  %v570_v30 = vld [vmem:[#allocation2 + $0x32] sm:$0xff]  ;;  %v571_v31 = vld [vmem:[#allocation2 + $0x3a] sm:$0xff] }
 0x153   : > { %v583_v32 = vpack.c.bf16 %v571_v31, %v570_v30 }
 0x154   : > { %800 = vmatmul.bf16.gmra.mxu2 %v581_v29 }
 0x15c   : > { %858 = vmatmul.bf16.gmra.mxu1 %v583_v32 }
 0x16c   : > { %1722 = vmatmul.msk.bf16.vlgmr.msra.gmra.mxu1 %vm358_vm1, %v1799_v51 }
 0x17c   : > { %1723 = vmatmul.msk.bf16.gmra.mxu1 %vm358_vm1, %v1800_v0 }
 0x18c   : > { %1724 = vmatmul.msk.bf16.gmra.mxu1 %vm358_vm1, %v1801_v19 }
 0x19c   : > { %1725 = vmatmul.msk.bf16.gmra.mxu1 %vm358_vm1, %v1802_v36 }
 0x19f   : > { %v815_v48 = vpop.f32.mrf.mxu3 }
 0x1a7   : > { %v786_v52 = vpop.f32.mrf.mxu2  ;;  %v817_v53 = vpop.f32.mrf.mxu3 }
 0x1a8   : > { %v787_v54 = vadd.f32 %v786_v52, %v2269_v50 }
 0x1a9   : > { %v844_v55 = vpop.f32.mrf.mxu1 }
 0x1aa   : > { %v816_v56 = vadd.f32 %v815_v48, %v787_v54 }
 0x1ac   : > { %v845_v57 = vadd.f32 %v844_v55, %v816_v56 }
 0x1ae   : > { %864 = vst [vmem:[#allocation2 + $0x1] sm:$0xff] %v845_v57 }
 0x1af   : > { %v788_v58 = vpop.f32.mrf.mxu2  ;;  %v820_v59 = vpop.f32.mrf.mxu3 }
 0x1b0   : > { %v789_v60 = vadd.f32 %v788_v58, %v2269_v50 }
 0x1b1   : > { %v846_v61 = vpop.f32.mrf.mxu1 }
 0x1b2   : > { %v818_v62 = vadd.f32 %v817_v53, %v789_v60 }
 0x1b4   : > { %v847_v63 = vadd.f32 %v846_v61, %v818_v62 }
 0x1b5   : > { %v872_v8 = vld [vmem:[#allocation2] sm:$0xff] }
 0x1b6   : > { %865 = vst [vmem:[#allocation2 + $0x9] sm:$0xff] %v847_v63  ;;  %v889_v1 = vpack.c.bf16 %v847_v63, %v845_v57 }
 0x1b7   : > { %v791_v2 = vpop.f32.mrf.mxu2  ;;  %v822_v4 = vpop.f32.mrf.mxu3 }
 0x1b8   : > { %v792_v3 = vadd.f32 %v791_v2, %v2269_v50  ;;  %1130 = vmatmul.bf16.vlgmr.msra.gmra.mxu2 %v889_v1 }
 0x1b9   : > { %v849_v5 = vpop.f32.mrf.mxu1 }
 0x1ba   : > { %v821_v6 = vadd.f32 %v820_v59, %v792_v3 }
 0x1bc   : > { %v850_v7 = vadd.f32 %v849_v5, %v821_v6 }
 0x1bd   : > { %v873_v9 = vld [vmem:[#allocation2 + $0x8] sm:$0xff] }
 0x1be   : > { %866 = vst [vmem:[#allocation2 + $0x11] sm:$0xff] %v850_v7  ;;  %v888_v10 = vpack.c.bf16 %v873_v9, %v872_v8  ;;  %v880_v20 = vld [vmem:[#allocation2 + $0x2] sm:$0xff]  ;;  %v2288_v9 = vperm.slane %v2168_v13, 2 }
 0x1bf   : > { %v793_v11 = vpop.f32.mrf.mxu2  ;;  %v825_v17 = vpop.f32.mrf.mxu3 }
 0x1c0   : > { %v794_v12 = vadd.f32 %v793_v11, %v2269_v50  ;;  %1101 = vmatmul.bf16.vlgmr.msrb.gmra.mxu0 %v888_v10 }
 0x1c1   : > { %v851_v14 = vpop.f32.mrf.mxu1 }
 0x1c2   : > { %v823_v15 = vadd.f32 %v822_v4, %v794_v12  ;;  %v2292_v12 = vperm.slane %v2168_v13, 3 }
 0x1c4   : > { %v852_v18 = vadd.f32 %v851_v14, %v823_v15 }
 0x1c5   : > { %v881_v21 = vld [vmem:[#allocation2 + $0xa] sm:$0xff] }
 0x1c6   : > { %867 = vst [vmem:[#allocation2 + $0x19] sm:$0xff] %v852_v18  ;;  %v892_v22 = vpack.c.bf16 %v852_v18, %v850_v7  ;;  %v890_v23 = vpack.c.bf16 %v881_v21, %v880_v20  ;;  %v874_v29 = vld [vmem:[#allocation2 + $0x10] sm:$0xff] }
 0x1c7   : > { %v796_v24 = vpop.f32.mrf.mxu2  ;;  %v827_v28 = vpop.f32.mrf.mxu3 }
 0x1c8   : > { %v797_v25 = vadd.f32 %v796_v24, %v2269_v50  ;;  %1135 = vmatmul.bf16.gmra.mxu2 %v892_v22  ;;  %1159 = vmatmul.bf16.vlgmr.msrb.gmra.mxu3 %v890_v23 }
 0x1c9   : > { %v854_v26 = vpop.f32.mrf.mxu1 }
 0x1ca   : > { %v826_v27 = vadd.f32 %v825_v17, %v797_v25 }
 0x1cc   : > { %v855_v16 = vadd.f32 %v854_v26, %v826_v27 }
 0x1cd   : > { %v875_v30 = vld [vmem:[#allocation2 + $0x18] sm:$0xff] }
 0x1ce   : > { %868 = vst [vmem:[#allocation2 + $0x21] sm:$0xff] %v855_v16  ;;  %v891_v31 = vpack.c.bf16 %v875_v30, %v874_v29  ;;  %v882_v38 = vld [vmem:[#allocation2 + $0x12] sm:$0xff] }
 0x1cf   : > { %v798_v32 = vpop.f32.mrf.mxu2  ;;  %v830_v42 = vpop.f32.mrf.mxu3 }
 0x1d0   : > { %v799_v33 = vadd.f32 %v798_v32, %v2269_v50  ;;  %1106 = vmatmul.bf16.gmra.mxu0 %v891_v31 }
 0x1d1   : > { %v856_v34 = vpop.f32.mrf.mxu1 }
 0x1d2   : > { %v828_v35 = vadd.f32 %v827_v28, %v799_v33 }
 0x1d4   : > { %v857_v37 = vadd.f32 %v856_v34, %v828_v35 }
 0x1d5   : > { %v883_v39 = vld [vmem:[#allocation2 + $0x1a] sm:$0xff] }
 0x1d6   : > { %869 = vst [vmem:[#allocation2 + $0x29] sm:$0xff] %v857_v37  ;;  %v895_v40 = vpack.c.bf16 %v857_v37, %v855_v16  ;;  %v893_v41 = vpack.c.bf16 %v883_v39, %v882_v38  ;;  %v876_v48 = vld [vmem:[#allocation2 + $0x20] sm:$0xff] }
 0x1d7   : > { %v801_v43 = vpop.f32.mrf.mxu2  ;;  %v832_v54 = vpop.f32.mrf.mxu3 }
 0x1d8   : > { %v802_v44 = vadd.f32 %v801_v43, %v2269_v50  ;;  %1140 = vmatmul.bf16.gmra.mxu2 %v895_v40  ;;  %1164 = vmatmul.bf16.gmra.mxu3 %v893_v41 }
 0x1d9   : > { %v859_v45 = vpop.f32.mrf.mxu1 }
 0x1da   : > { %v831_v46 = vadd.f32 %v830_v42, %v802_v44 }
 0x1dc   : > { %v860_v47 = vadd.f32 %v859_v45, %v831_v46 }
 0x1dd   : > { %v877_v49 = vld [vmem:[#allocation2 + $0x28] sm:$0xff] }
 0x1de   : > { %870 = vst [vmem:[#allocation2 + $0x31] sm:$0xff] %v860_v47  ;;  %v894_v51 = vpack.c.bf16 %v877_v49, %v876_v48  ;;  %v884_v58 = vld [vmem:[#allocation2 + $0x22] sm:$0xff] }
 0x1df   : > { %v803_v52 = vpop.f32.mrf.mxu2 }
 0x1e0   : > { %v804_v53 = vadd.f32 %v803_v52, %v2269_v50  ;;  %1111 = vmatmul.bf16.gmra.mxu0 %v894_v51 }
 0x1e1   : > { %v861_v56 = vpop.f32.mrf.mxu1 }
 0x1e2   : > { %v833_v55 = vadd.f32 %v832_v54, %v804_v53 }
 0x1e4   : > { %v862_v57 = vadd.f32 %v861_v56, %v833_v55 }
 0x1e5   : > { %v885_v59 = vld [vmem:[#allocation2 + $0x2a] sm:$0xff] }
 0x1e6   : > { %871 = vst [vmem:[#allocation2 + $0x39] sm:$0xff] %v862_v57  ;;  %v898_v60 = vpack.c.bf16 %v862_v57, %v860_v47  ;;  %v896_v61 = vpack.c.bf16 %v885_v59, %v884_v58  ;;  %v878_v62 = vld [vmem:[#allocation2 + $0x30] sm:$0xff] }
 0x1e8   : > { %1145 = vmatmul.bf16.gmra.mxu2 %v898_v60  ;;  %1169 = vmatmul.bf16.gmra.mxu3 %v896_v61 }
 0x1e9   : > { %v1262_v50 = vpop.f32.mrf.mxu1 }
 0x1ea   : > { %v1263_v20 = vadd.f32 %v1262_v50, %v2292_v12 }
 0x1ed   : > { %v879_v63 = vld [vmem:[#allocation2 + $0x38] sm:$0xff] }
 0x1ee   : > { %v897_v0 = vpack.c.bf16 %v879_v63, %v878_v62  ;;  %v886_v1 = vld [vmem:[#allocation2 + $0x32] sm:$0xff]  ;;  %v887_v2 = vld [vmem:[#allocation2 + $0x3a] sm:$0xff] }
 0x1ef   : > { %v899_v3 = vpack.c.bf16 %v887_v2, %v886_v1 }
 0x1f0   : > { %1116 = vmatmul.bf16.gmra.mxu0 %v897_v0 }
 0x1f1   : > { %v1264_v6 = vpop.f32.mrf.mxu1 }
 0x1f2   : > { %v1265_v25 = vadd.f32 %v1264_v6, %v2292_v12 }
 0x1f8   : > { %1174 = vmatmul.bf16.gmra.mxu3 %v899_v3 }
 0x1f9   : > { %v1267_v18 = vpop.f32.mrf.mxu1 }
 0x1fa   : > { %v1268_v37 = vadd.f32 %v1267_v18, %v2292_v12 }
 0x201   : > { %v1269_v29 = vpop.f32.mrf.mxu1 }
 0x202   : > { %v1270_v44 = vadd.f32 %v1269_v29, %v2292_v12 }
 0x209   : > { %v1272_v40 = vpop.f32.mrf.mxu1 }
 0x20a   : > { %v1273_v58 = vadd.f32 %v1272_v40, %v2292_v12 }
 0x211   : > { %v1274_v55 = vpop.f32.mrf.mxu1 }
 0x212   : > { %v1275_v0 = vadd.f32 %v1274_v55, %v2292_v12 }
 0x219   : > { %v1277_v50 = vpop.f32.mrf.mxu1 }
 0x23b   : > { %v1131_v4 = vpop.f32.mrf.mxu2 }
 0x23d   : > { %v1102_v5 = vpop.f32.mrf.mxu0 }
 0x23e   : > { %v1103_v10 = vadd.f32 %v1102_v5, %v2288_v9 }
 0x240   : > { %v1132_v17 = vadd.f32 %v1131_v4, %v1103_v10 }
 0x243   : > { %v1133_v7 = vpop.f32.mrf.mxu2 }
 0x245   : > { %v1104_v8 = vpop.f32.mrf.mxu0 }
 0x246   : > { %v1105_v15 = vadd.f32 %v1104_v8, %v2288_v9 }
 0x248   : > { %v1134_v22 = vadd.f32 %v1133_v7, %v1105_v15  ;;  %v1278_v15 = vadd.f32 %v1277_v50, %v2292_v12 }
 0x24b   : > { %v1160_v11 = vpop.f32.mrf.mxu3  ;;  %v1136_v19 = vpop.f32.mrf.mxu2 }
 0x24c   : > { %v1161_v21 = vadd.f32 %v1160_v11, %v1132_v17 }
 0x24d   : > { %v1107_v14 = vpop.f32.mrf.mxu0 }
 0x24e   : > { %v1282_v24 = vadd.f32 %v1263_v20, %v1161_v21  ;;  %v1108_v31 = vadd.f32 %v1107_v14, %v2288_v9 }
 0x250   : > { %v1290_v16 = vmax.f32 %v1282_v24, 0.0  ;;  %v1137_v36 = vadd.f32 %v1136_v19, %v1108_v31  ;;  %v1279_v19 = vpop.f32.mrf.mxu1 }
 0x253   : > { %v1162_v23 = vpop.f32.mrf.mxu3  ;;  %v1138_v30 = vpop.f32.mrf.mxu2 }
 0x254   : > { %v1163_v26 = vadd.f32 %v1162_v23, %v1134_v22  ;;  %v1280_v23 = vadd.f32 %v1279_v19, %v2292_v12 }
 0x255   : > { %v1109_v27 = vpop.f32.mrf.mxu0 }
 0x256   : > { %v1283_v13 = vadd.f32 %v1265_v25, %v1163_v26  ;;  %v1110_v35 = vadd.f32 %v1109_v27, %v2288_v9 }
 0x258   : > { %v1291_v28 = vmax.f32 %v1283_v13, 0.0  ;;  %v1139_v39 = vadd.f32 %v1138_v30, %v1110_v35 }
 0x25a   : > { %v1811_v32 = vpack.c.bf16 %v1291_v28, %v1290_v16 }
 0x25b   : > { %v1165_v33 = vpop.f32.mrf.mxu3  ;;  %v1141_v41 = vpop.f32.mrf.mxu2 }
 0x25c   : > { %1812 = vst [vmem:[%s2301_s14] sm:$0xff] %v1811_v32   ;;  %v1166_v38 = vadd.f32 %v1165_v33, %v1137_v36 }
 0x25d   : > { %v1112_v34 = vpop.f32.mrf.mxu0 }
 0x25e   : > { %v1284_v43 = vadd.f32 %v1268_v37, %v1166_v38  ;;  %v1113_v51 = vadd.f32 %v1112_v34, %v2288_v9 }
 0x260   : > { %v1292_v48 = vmax.f32 %v1284_v43, 0.0  ;;  %v1142_v57 = vadd.f32 %v1141_v41, %v1113_v51 }
 0x263   : > { %v1167_v42 = vpop.f32.mrf.mxu3  ;;  %v1143_v54 = vpop.f32.mrf.mxu2 }
 0x264   : > { %v1168_v45 = vadd.f32 %v1167_v42, %v1139_v39 }
 0x265   : > { %v1114_v47 = vpop.f32.mrf.mxu0 }
 0x266   : > { %v1285_v46 = vadd.f32 %v1270_v44, %v1168_v45  ;;  %v1115_v56 = vadd.f32 %v1114_v47, %v2288_v9 }
 0x268   : > { %v1293_v49 = vmax.f32 %v1285_v46, 0.0  ;;  %v1144_v61 = vadd.f32 %v1143_v54, %v1115_v56 }
 0x26a   : > { %v1816_v52 = vpack.c.bf16 %v1293_v49, %v1292_v48 }
 0x26b   : > { %v1170_v53 = vpop.f32.mrf.mxu3  ;;  %v1146_v3 = vpop.f32.mrf.mxu2 }
 0x26c   : > { %1828 = vst [vmem:[%s2301_s14 + $0x8] sm:$0xff] %v1816_v52   ;;  %v1171_v59 = vadd.f32 %v1170_v53, %v1142_v57 }
 0x26d   : > { %v1117_v60 = vpop.f32.mrf.mxu0 }
 0x26e   : > { %v1286_v63 = vadd.f32 %v1273_v58, %v1171_v59  ;;  %v1118_v6 = vadd.f32 %v1117_v60, %v2288_v9 }
 0x270   : > { %v1294_v4 = vmax.f32 %v1286_v63, 0.0  ;;  %v1147_v14 = vadd.f32 %v1146_v3, %v1118_v6 }
 0x273   : > { %v1172_v62 = vpop.f32.mrf.mxu3  ;;  %v1148_v18 = vpop.f32.mrf.mxu2 }
 0x274   : > { %v1173_v1 = vadd.f32 %v1172_v62, %v1144_v61 }
 0x275   : > { %v1119_v8 = vpop.f32.mrf.mxu0 }
 0x276   : > { %v1287_v2 = vadd.f32 %v1275_v0, %v1173_v1  ;;  %v1120_v11 = vadd.f32 %v1119_v8, %v2288_v9 }
 0x278   : > { %v1295_v5 = vmax.f32 %v1287_v2, 0.0  ;;  %v1149_v20 = vadd.f32 %v1148_v18, %v1120_v11 }
 0x27a   : > { %v1821_v7 = vpack.c.bf16 %v1295_v5, %v1294_v4 }
 0x27b   : > { %v1175_v10 = vpop.f32.mrf.mxu3 }
 0x27c   : > { %1829 = vst [vmem:[%s2301_s14 + $0x10] sm:$0xff] %v1821_v7   ;;  %v1176_v17 = vadd.f32 %v1175_v10, %v1147_v14 }
 0x27e   : > { %v1288_v22 = vadd.f32 %v1278_v15, %v1176_v17 }
 0x280   : > { %v1296_v25 = vmax.f32 %v1288_v22, 0.0 }
 0x283   : > { %v1177_v21 = vpop.f32.mrf.mxu3 }
 0x284   : > { %v1178_v24 = vadd.f32 %v1177_v21, %v1149_v20 }
 0x286   : > { %v1289_v9 = vadd.f32 %v1280_v23, %v1178_v24 }
 0x288   : > { %v1297_v26 = vmax.f32 %v1289_v9, 0.0 }
 0x28a   : > { %v1826_v27 = vpack.c.bf16 %v1297_v26, %v1296_v25 }
 0x28c   : > { %1830 = vst [vmem:[%s2301_s14 + $0x18] sm:$0xff] %v1826_v27  }
 0x28d   : > { %1905 = shalt.err (!%p1902_p3)
}
 0x28e   : > { %s1944_s26 = smov 4  }
 0x28f   : > { %1836 = dma.vmem_to_hbm [thread:$0]  (%p2018_p5), %s1328_s19, 512, %s1330_s20, %s1315_s25, %s1942_s11, %s1942_s11, %s1944_s26  }
 0x290 PF: > { %p1842_p4 = scmp.ge.s32.totalorder %s1940_s24, 2  ;;  %s1344_s14 = sand.u32 1, %s1928_s21  }
 0x291   : > { %s1345_s16 = scalar_lea.sflag [#allocation4], %s1344_s14 }
 0x292   : > { %p1839_p7 = pnand %p1842_p4, %p2022_p6 }
 0x294   : > { %p1840_p8 = pneg %p1839_p7 }
 0x296   : > { %1923 = dma.done.wait (%p1840_p8), %s1345_s16, 512  }
 0x297   : > { %1925 = vsyncadd (%p1840_p8), %s1345_s16, 4294966784  ;;  %p16_p9 = scmp.ge.s32.totalorder %s2005_s27, 4   ;;  %s2363_s21 = smov %s1932_s22 }
 0x298   : > { %s2364_s22 = smov %s1936_s23  ;;  %s2365_s23 = smov %s2016_s30 }
 0x299   : > { %s2366_s24 = smov %s2005_s27  ;;  %18 = sbr.rel (!%p16_p9) target bundleno = 3 (0x3), region = 80 }
 0x29e   :  { %1351 = vsyncpa [#allocation4], 1 }
 0x29f   :  { %1353 = vsyncpa [#allocation4 + $0x1], 1 }

</bundles_post_ra>
